<compile_context>
chip_gen: v7x
topology: tpu7x:2x2x1
jax: 0.10.0
libtpu: 0.0.40
codegen_flags: <defaults>
</compile_context>

<pallas_src>
import functools

import jax
import jax.numpy as jnp
from jax.experimental import pallas as pl
from jax.experimental.pallas import tpu as pltpu


_EPS = 1e-5


# ----------------------------------------------------------------------------
# Kernel 1: fused BatchNorm (whole flattened array in one VMEM block)
# ----------------------------------------------------------------------------
def _bn_fused_kernel(x_ref, gb_ref, out_ref, *, inv_n, eps):
    x = x_ref[...]                                            # (R, D)
    mean = jnp.sum(x, axis=0, keepdims=True) * inv_n          # (1, D)
    d = x - mean
    var = jnp.sum(d * d, axis=0, keepdims=True) * inv_n       # biased variance
    scale = gb_ref[0:1, :] * jax.lax.rsqrt(var + eps)
    out_ref[...] = d * scale + gb_ref[1:2, :]


# ----------------------------------------------------------------------------
# Kernel 2a: tiled BatchNorm statistics (reduction over row tiles)
#   output ss = (2, D): row 0 = scale (gamma/sqrt(var+eps)), row 1 = shift
# ----------------------------------------------------------------------------
def _bn_stats_kernel(x_ref, gb_ref, ss_ref, acc_ref, *, inv_n, eps):
    step = pl.program_id(0)

    @pl.when(step == 0)
    def _():
        acc_ref[...] = jnp.zeros_like(acc_ref)

    x = x_ref[...]                                            # (TR, D)
    s = jnp.sum(x, axis=0, keepdims=True)                     # (1, D)
    sq = jnp.sum(x * x, axis=0, keepdims=True)                # (1, D)
    acc_ref[...] += jnp.concatenate([s, sq], axis=0)          # (2, D)

    @pl.when(step == pl.num_programs(0) - 1)
    def _():
        acc = acc_ref[...]
        mean = acc[0:1, :] * inv_n
        var = acc[1:2, :] * inv_n - mean * mean
        scale = gb_ref[0:1, :] * jax.lax.rsqrt(var + eps)
        shift = gb_ref[1:2, :] - mean * scale
        ss_ref[...] = jnp.concatenate([scale, shift], axis=0)


# ----------------------------------------------------------------------------
# Kernel 2b: tiled BatchNorm apply (element-wise, parallel over row tiles)
# ----------------------------------------------------------------------------
def _bn_apply_kernel(x_ref, ss_ref, out_ref):
    out_ref[...] = x_ref[...] * ss_ref[0:1, :] + ss_ref[1:2, :]


# ----------------------------------------------------------------------------
# Kernel 3: InstanceNorm1d (per-batch block, normalize over the node axis)
# ----------------------------------------------------------------------------
def _instance_norm_kernel(x_ref, gb_ref, out_ref, *, eps):
    x = x_ref[0]                                              # (N, D)
    mean = jnp.mean(x, axis=0, keepdims=True)
    d = x - mean
    var = jnp.mean(d * d, axis=0, keepdims=True)
    out_ref[0] = d * (gb_ref[0:1, :] * jax.lax.rsqrt(var + eps)) + gb_ref[1:2, :]


# ----------------------------------------------------------------------------
# Wrappers
# ----------------------------------------------------------------------------
def _row_tile(rows):
    for t in (512, 256, 128, 64, 32, 16, 8):
        if t <= rows and rows % t == 0:
            return t
    return rows


def batch_norm_forward(x, gamma, beta, eps=_EPS, force_tiled=False):
    """BatchNorm1d (training-mode statistics) over x.view(-1, D)."""
    orig_shape = x.shape
    D = orig_shape[-1]
    x2 = x.reshape(-1, D).astype(jnp.float32)
    R = x2.shape[0]
    gb = jnp.stack([gamma, beta]).astype(jnp.float32)          # (2, D)
    inv_n = 1.0 / float(R)

    fits_single_block = (R * D * 4) <= (4 << 20)
    if fits_single_block and not force_tiled:
        y = pl.pallas_call(
            functools.partial(_bn_fused_kernel, inv_n=inv_n, eps=eps),
            out_shape=jax.ShapeDtypeStruct((R, D), jnp.float32),
            grid=(1,),
            in_specs=[
                pl.BlockSpec((R, D), lambda i: (0, 0)),
                pl.BlockSpec((2, D), lambda i: (0, 0)),
            ],
            out_specs=pl.BlockSpec((R, D), lambda i: (0, 0)),
        )(x2, gb)
        return y.reshape(orig_shape)

    tr = _row_tile(R)
    nsteps = R // tr

    # pass 1: reduce -> per-feature scale/shift (accumulator resident across grid)
    ss = pl.pallas_call(
        functools.partial(_bn_stats_kernel, inv_n=inv_n, eps=eps),
        out_shape=jax.ShapeDtypeStruct((2, D), jnp.float32),
        grid=(nsteps,),
        in_specs=[
            pl.BlockSpec((tr, D), lambda i: (i, 0)),
            pl.BlockSpec((2, D), lambda i: (0, 0)),
        ],
        out_specs=pl.BlockSpec((2, D), lambda i: (0, 0)),
        scratch_shapes=[pltpu.VMEM((2, D), jnp.float32)],
        compiler_params=pltpu.CompilerParams(dimension_semantics=("arbitrary",)),
    )(x2, gb)

    # pass 2: element-wise apply (parallel over row tiles)
    y = pl.pallas_call(
        _bn_apply_kernel,
        out_shape=jax.ShapeDtypeStruct((R, D), jnp.float32),
        grid=(nsteps,),
        in_specs=[
            pl.BlockSpec((tr, D), lambda i: (i, 0)),
            pl.BlockSpec((2, D), lambda i: (0, 0)),
        ],
        out_specs=pl.BlockSpec((tr, D), lambda i: (i, 0)),
        compiler_params=pltpu.CompilerParams(dimension_semantics=("parallel",)),
    )(x2, ss)
    return y.reshape(orig_shape)


def instance_norm_forward(x, gamma, beta, eps=_EPS):
    """InstanceNorm1d over x.permute(0,2,1), expressed directly in (B, N, D) layout."""
    B, N, D = x.shape
    gb = jnp.stack([gamma, beta]).astype(jnp.float32)          # (2, D)
    return pl.pallas_call(
        functools.partial(_instance_norm_kernel, eps=eps),
        out_shape=jax.ShapeDtypeStruct((B, N, D), jnp.float32),
        grid=(B,),
        in_specs=[
            pl.BlockSpec((1, N, D), lambda b: (b, 0, 0)),
            pl.BlockSpec((2, D), lambda b: (0, 0)),
        ],
        out_specs=pl.BlockSpec((1, N, D), lambda b: (b, 0, 0)),
        compiler_params=pltpu.CompilerParams(dimension_semantics=("parallel",)),
    )(x.astype(jnp.float32), gb)


def normalization_forward(x, gamma, beta, normalization="batch"):
    if normalization == "batch":
        return batch_norm_forward(x, gamma, beta)
    elif normalization == "instance":
        return instance_norm_forward(x, gamma, beta)
    else:
        return x


# ----------------------------------------------------------------------------
# Pure-JAX references for verification
# ----------------------------------------------------------------------------
def batch_norm_ref(x, gamma, beta, eps=_EPS):
    D = x.shape[-1]
    x2 = x.reshape(-1, D)
    mean = jnp.mean(x2, axis=0)
    var = jnp.mean((x2 - mean) ** 2, axis=0)
    y = (x2 - mean) / jnp.sqrt(var + eps) * gamma + beta
    return y.reshape(x.shape)


def instance_norm_ref(x, gamma, beta, eps=_EPS):
    mean = jnp.mean(x, axis=1, keepdims=True)
    var = jnp.mean((x - mean) ** 2, axis=1, keepdims=True)
    return (x - mean) / jnp.sqrt(var + eps) * gamma + beta


# ----------------------------------------------------------------------------
if __name__ == "__main__":
    B, N, D = 2, 16, 128           # embed_dim on the lane axis (lane-dense)

    key = jax.random.PRNGKey(0)
    kx, kg, kb, kx2 = jax.random.split(key, 4)
    x = jax.random.normal(kx, (B, N, D), jnp.float32) * 2.0 + 0.5
    gamma = 1.0 + 0.1 * jax.random.normal(kg, (D,), jnp.float32)
    beta = 0.1 * jax.random.normal(kb, (D,), jnp.float32)

    # fused single-block batch-norm path + instance-norm path
    y_bn = normalization_forward(x, gamma, beta, normalization="batch")
    y_in = normalization_forward(x, gamma, beta, normalization="instance")
    y_id = normalization_forward(x, gamma, beta, normalization="none")
    jax.block_until_ready((y_bn, y_in, y_id))

    assert jnp.allclose(y_bn, batch_norm_ref(x, gamma, beta), atol=1e-4, rtol=1e-4)
    assert jnp.allclose(y_in, instance_norm_ref(x, gamma, beta), atol=1e-4, rtol=1e-4)
    assert jnp.allclose(y_id, x)

    # exercise the tiled (multi-grid-step) batch-norm path as well
    x_big = jax.random.normal(kx2, (8, 128, D), jnp.float32)   # 1024 rows -> 2 tiles of 512
    y_big = batch_norm_forward(x_big, gamma, beta, force_tiled=True)
    jax.block_until_ready(y_big)
    assert jnp.allclose(y_big, batch_norm_ref(x_big, gamma, beta), atol=1e-4, rtol=1e-4)

    print("KERNEL_OK")
</pallas_src>

<mosaic_0001>
module attributes {stable_mosaic.version = 11 : i64} {
  func.func @_bn_fused_kernel(%arg0: i32, %arg1: memref<32x128xf32, #tpu.memory_space<vmem>>, %arg2: memref<2x128xf32, #tpu.memory_space<vmem>>, %arg3: memref<32x128xf32, #tpu.memory_space<vmem>>) attributes {dimension_semantics = [#tpu.dimension_semantics<arbitrary>], iteration_bounds = array<i64: 1>, scalar_prefetch = 0 : i64, scratch_operands = 0 : i64, tpu.core_type = #tpu.core_type<tc>, window_params = [{pipeline_mode = #tpu.pipeline_mode<synchronous>, transform_indices = @transform_0, window_bounds = array<i64: 32, 128>}, {pipeline_mode = #tpu.pipeline_mode<synchronous>, transform_indices = @transform_1, window_bounds = array<i64: 2, 128>}, {pipeline_mode = #tpu.pipeline_mode<synchronous>, transform_indices = @transform_2, window_bounds = array<i64: 32, 128>}]} {
    %c0 = arith.constant 0 : index
    %c0_0 = arith.constant 0 : index
    %0 = vector.load %arg1[%c0, %c0_0] : memref<32x128xf32, #tpu.memory_space<vmem>>, vector<32x128xf32>
    %cst = arith.constant dense<0.000000e+00> : vector<128xf32>
    %1 = vector.multi_reduction <add>, %0, %cst [0] : vector<32x128xf32> to vector<128xf32>
    %2 = vector.shape_cast %1 : vector<128xf32> to vector<1x128xf32>
    %cst_1 = arith.constant 3.125000e-02 : f32
    %3 = vector.broadcast %cst_1 : f32 to vector<1x128xf32>
    %4 = arith.mulf %2, %3 : vector<1x128xf32>
    %5 = vector.broadcast %4 : vector<1x128xf32> to vector<32x128xf32>
    %6 = arith.subf %0, %5 : vector<32x128xf32>
    %7 = arith.mulf %6, %6 : vector<32x128xf32>
    %cst_2 = arith.constant dense<0.000000e+00> : vector<128xf32>
    %8 = vector.multi_reduction <add>, %7, %cst_2 [0] : vector<32x128xf32> to vector<128xf32>
    %9 = vector.shape_cast %8 : vector<128xf32> to vector<1x128xf32>
    %cst_3 = arith.constant 3.125000e-02 : f32
    %10 = vector.broadcast %cst_3 : f32 to vector<1x128xf32>
    %11 = arith.mulf %9, %10 : vector<1x128xf32>
    %c0_4 = arith.constant 0 : index
    %c0_5 = arith.constant 0 : index
    %12 = vector.load %arg2[%c0_4, %c0_5] : memref<2x128xf32, #tpu.memory_space<vmem>>, vector<1x128xf32>
    %cst_6 = arith.constant 9.99999974E-6 : f32
    %13 = vector.broadcast %cst_6 : f32 to vector<1x128xf32>
    %14 = arith.addf %11, %13 : vector<1x128xf32>
    %15 = math.rsqrt %14 : vector<1x128xf32>
    %16 = arith.mulf %12, %15 : vector<1x128xf32>
    %17 = vector.broadcast %16 : vector<1x128xf32> to vector<32x128xf32>
    %18 = arith.mulf %6, %17 : vector<32x128xf32>
    %c1 = arith.constant 1 : index
    %c0_7 = arith.constant 0 : index
    %19 = vector.load %arg2[%c1, %c0_7] : memref<2x128xf32, #tpu.memory_space<vmem>>, vector<1x128xf32>
    %20 = vector.broadcast %19 : vector<1x128xf32> to vector<32x128xf32>
    %21 = arith.addf %18, %20 : vector<32x128xf32>
    %c0_8 = arith.constant 0 : index
    %c0_9 = arith.constant 0 : index
    %22 = vector.load %arg3[%c0_8, %c0_9] : memref<32x128xf32, #tpu.memory_space<vmem>>, vector<32x128xf32>
    tpu.vector_store %arg3[%c0_8, %c0_9], %21 {strides = array<i32>} : memref<32x128xf32, #tpu.memory_space<vmem>>, vector<32x128xf32>,
    return
  }
  func.func @transform_0(%arg0: i32) -> (i32, i32) {
    %c0_i32 = arith.constant 0 : i32
    %c0_i32_0 = arith.constant 0 : i32
    %c0_i32_1 = arith.constant 0 : i32
    return %c0_i32, %c0_i32_0 : i32, i32
  }
  func.func @transform_1(%arg0: i32) -> (i32, i32) {
    %c0_i32 = arith.constant 0 : i32
    %c0_i32_0 = arith.constant 0 : i32
    %c0_i32_1 = arith.constant 0 : i32
    return %c0_i32, %c0_i32_0 : i32, i32
  }
  func.func @transform_2(%arg0: i32) -> (i32, i32) {
    %c0_i32 = arith.constant 0 : i32
    %c0_i32_0 = arith.constant 0 : i32
    %c0_i32_1 = arith.constant 0 : i32
    return %c0_i32, %c0_i32_0 : i32, i32
  }
}

</mosaic_0001>

<bundles_post_ra>
// kernel: tpu_custom_call.1
= control target key start
LH: loop header
LB: loop body
LE: loop exit
PB: predicated region body
PF: predicated region fallthrough
CT: control target
= control target key end

     0   :  { %7 = vsyncpa [#allocation3], 0  ;;  %s210_s0 = inlined_call_operand.hbm [shape: f32[32,128], index: 0, kind: input, shape index: {}]   ;;  %s211_s1 = inlined_call_operand.vmem [shape: f32[2,128], index: 1, kind: input, shape index: {}]   ;;  %s212_s2 = inlined_call_operand.hbm [shape: f32[32,128], index: 2, kind: output, shape index: {}]  }
   0x1   :  { %8 = vsyncpa [#allocation4], 0  ;;  %s155_s9 = smov [#allocation2]   ;;  %s107_s13 = scalar_lea.hbm %s210_s0, 512 }
   0x2   :  { %s14_s10 = sshll.u32 %s155_s9, 4  ;;  %p108_p0 = scmp.ne.s32.totalorder %s210_s0, %s107_s13  ;;  %s15_s10 = int_to_ptr.vmem [resolvable:$true] %s14_s10 }
   0x3   :  { %p111_p1 = scmp.lt.u32.totalorder %s107_s13, %s210_s0 }
   0x5   :  { %p113_p2 = pnand %p111_p1, %p108_p0 }
   0x7   :  { %116 = shalt.err (!%p113_p2)
}
   0x8   :  { %s117_s18 = scalar_lea.vmem %s15_s10, 512  ;;  %p122_p4 = scmp.lt.s32.totalorder %s15_s10, %s15_s10 }
   0x9   :  { %p118_p3 = scmp.ne.s32.totalorder %s15_s10, %s117_s18  ;;  %p123_p5 = scmp.lt.s32.totalorder %s117_s18, %s117_s18 }
   0xb   :  { %p124_p6 = por %p123_p5, %p122_p4 }
   0xd   :  { %p125_p7 = pnand %p124_p6, %p118_p3 }
   0xf   :  { %128 = shalt.err (!%p125_p7)
}
  0x10   :  { %s156_s19 = smov 128   ;;  %s157_s20 = smov 8  }
  0x11   :  { %20 = dma.hbm_to_vmem [thread:$0]  %s210_s0, 512, %s15_s10, [#allocation3], %s156_s19, %s156_s19, %s157_s20  }
  0x12   :  { %151 = dma.done.wait [#allocation3], 512  }
  0x13   :  { %152 = vsyncadd [#allocation3], 4294966784  ;;  %v26_v0 = vld [vmem:[#allocation2] sm:$0xff]  ;;  %v27_v1 = vld [vmem:[#allocation2 + $0x8] sm:$0xff]  ;;  %v62_v33 = vlaneseq  ;;  %s158_s26 = smov [#allocation5]  }
  0x14   :  { %v28_v2 = vld [vmem:[#allocation2 + $0x10] sm:$0xff]  ;;  %v30_v3 = vadd.f32 %v27_v1, %v26_v0  ;;  %v29_v4 = vld [vmem:[#allocation2 + $0x18] sm:$0xff]  ;;  %v58_v35 = vld [vmem:[%s211_s1] sm:$0x1]  ;;  %s88_s27 = sshll.u32 %s158_s26, 4  ;;  %s89_s27 = int_to_ptr.vmem [resolvable:$true] %s88_s27 }
  0x15   :  { %v63_v34 = vshrl.u32 %v62_v33, 7  ;;  %v100_v40 = vld [vmem:[%s211_s1 + $0x1] ss:$0 sm:$0xff]  ;;  %s129_s28 = scalar_lea.vmem %s89_s27, 512  ;;  %p134_p9 = scmp.lt.s32.totalorder %s89_s27, %s89_s27 }
  0x16   :  { %v31_v5 = vadd.f32 %v30_v3, %v28_v2  ;;  %p130_p8 = scmp.ne.s32.totalorder %s89_s27, %s129_s28  ;;  %p135_p10 = scmp.lt.s32.totalorder %s129_s28, %s129_s28 }
  0x17   :  { %v64_v36 = vsub.s32 0, %v63_v34 }
  0x18   :  { %v32_v6 = vadd.f32 %v31_v5, %v29_v4  ;;  %p136_p11 = por %p135_p10, %p134_p9 }
  0x1a   :  { %v33_v7 = vrot.slane %v32_v6, 4  ;;  %p137_p12 = pnand %p136_p11, %p130_p8 }
  0x1c   :  { %v34_v8 = vadd.f32 %v33_v7, %v32_v6 }
  0x1e   :  { %v35_v9 = vrot.slane %v34_v8, 2 }
  0x20   :  { %v36_v10 = vadd.f32 %v35_v9, %v34_v8 }
  0x22   :  { %v37_v11 = vrot.slane %v36_v10, 1 }
  0x24   :  { %v38_v12 = vadd.f32 %v37_v11, %v36_v10 }
  0x26   :  { %v39_v13 = vmul.f32 0.03125, %v38_v12 }
  0x28   :  { %v40_v14 = vsub.f32 %v26_v0, %v39_v13  ;;  %v41_v15 = vsub.f32 %v27_v1, %v39_v13  ;;  %v42_v16 = vsub.f32 %v28_v2, %v39_v13  ;;  %v43_v17 = vsub.f32 %v29_v4, %v39_v13 }
  0x2a   :  { %v44_v18 = vmul.f32 %v40_v14, %v40_v14  ;;  %v45_v19 = vmul.f32 %v41_v15, %v41_v15  ;;  %v46_v20 = vmul.f32 %v42_v16, %v42_v16  ;;  %v47_v21 = vmul.f32 %v43_v17, %v43_v17 }
  0x2c   :  { %v48_v22 = vadd.f32 %v45_v19, %v44_v18 }
  0x2e   :  { %v49_v23 = vadd.f32 %v48_v22, %v46_v20 }
  0x30   :  { %v50_v24 = vadd.f32 %v49_v23, %v47_v21 }
  0x32   :  { %v51_v25 = vrot.slane %v50_v24, 4 }
  0x34   :  { %v52_v26 = vadd.f32 %v51_v25, %v50_v24 }
  0x36   :  { %v53_v27 = vrot.slane %v52_v26, 2 }
  0x38   :  { %v54_v28 = vadd.f32 %v53_v27, %v52_v26 }
  0x3a   :  { %v55_v29 = vrot.slane %v54_v28, 1 }
  0x3c   :  { %v56_v30 = vadd.f32 %v55_v29, %v54_v28 }
  0x3e   :  { %v57_v31 = vmul.f32 0.03125, %v56_v30 }
  0x40   :  { %v59_v32 = vadd.f32 1e-05, %v57_v31 }
  0x42   :  { %105 = vrsqrt.f32 %v59_v32 }
  0x4c   :  { %v106_v37 = vpop.eup %105 }
  0x4d   :  { %v61_v38 = vmul.f32 %v106_v37, %v58_v35 }
  0x4f   :  { %v65_v39 = vrot.slane %v61_v38, %v64_v36 }
  0x51   :  { %v66_v41 = vmul.f32 %v65_v39, %v40_v14  ;;  %v67_v42 = vmul.f32 %v65_v39, %v41_v15  ;;  %v68_v43 = vmul.f32 %v65_v39, %v42_v16  ;;  %v69_v44 = vmul.f32 %v65_v39, %v43_v17 }
  0x53   :  { %v75_v45 = vadd.f32 %v100_v40, %v66_v41  ;;  %v76_v46 = vadd.f32 %v100_v40, %v67_v42  ;;  %v77_v47 = vadd.f32 %v100_v40, %v68_v43  ;;  %v78_v48 = vadd.f32 %v100_v40, %v69_v44 }
  0x55   :  { %79 = vst [vmem:[#allocation5] sm:$0xff] %v75_v45  ;;  %80 = vst [vmem:[#allocation5 + $0x8] sm:$0xff] %v76_v46 }
  0x56   :  { %81 = vst [vmem:[#allocation5 + $0x10] sm:$0xff] %v77_v47  ;;  %82 = vst [vmem:[#allocation5 + $0x18] sm:$0xff] %v78_v48 }
  0x57   :  { %140 = shalt.err (!%p137_p12)
}
  0x58   :  { %s141_s30 = scalar_lea.hbm %s212_s2, 512 }
  0x59   :  { %p142_p13 = scmp.ne.s32.totalorder %s212_s2, %s141_s30  ;;  %p145_p0 = scmp.lt.u32.totalorder %s141_s30, %s212_s2 }
  0x5b   :  { %p147_p1 = pnand %p145_p0, %p142_p13 }
  0x5d   :  { %150 = shalt.err (!%p147_p1)
}
  0x5e   :  { %94 = dma.vmem_to_hbm [thread:$0]  %s89_s27, 512, %s212_s2, [#allocation4], %s156_s19, %s156_s19, %s157_s20  }
  0x5f   :  { %153 = dma.done.wait [#allocation4], 512  }
  0x60   :  { %154 = vsyncadd [#allocation4], 4294966784 }
  0x61   :  { %98 = vsyncpa [#allocation3], 1 }
  0x62   :  { %99 = vsyncpa [#allocation4], 1 }

</bundles_post_ra>
